<compile_context>
chip_gen: v6e
topology: v6e:2x2x1
jax: 0.10.0
libtpu: 0.0.40
codegen_flags: <defaults>
</compile_context>

<pallas_src>
import numpy as np

import jax
import jax.numpy as jnp
from jax.experimental import pallas as pl
from jax.experimental.pallas import tpu as pltpu


LANE = 128      # lanes per vreg row (same on v5e/v6e/v7x)
SUBLANE = 8     # f32 sublanes per vreg
TILE_B = 2048   # batch tile for the large-batch (gridded) path


def _round_up(n, m):
    return ((n + m - 1) // m) * m


def _fused_linear_kernel(x_ref, w_ref, b_ref, o_ref):
    # x_ref: [TB, 1], w_ref: [1, D_pad], b_ref: [1, D_pad], o_ref: [TB, D_pad]
    # Fan-in is 1, so this is a pure VPU broadcast-FMA; no MXU involved.
    o_ref[...] = x_ref[...] * w_ref[...] + b_ref[...]


def fused_learnable_inputs(x_pad, w_cat, b_cat, *, tile_b=TILE_B):
    """[B_pad,1] x [1,D_pad] + [1,D_pad] -> [B_pad,D_pad] broadcast FMA.

    B_pad must be a multiple of 8. D_pad must be a multiple of 128.
    """
    B_pad = x_pad.shape[0]
    D_pad = w_cat.shape[1]

    if B_pad <= tile_b:
        # Grid-less single-shot call: the whole (small) problem lands in VMEM
        # once; no software-pipeline prologue/epilogue is generated.
        return pl.pallas_call(
            _fused_linear_kernel,
            out_shape=jax.ShapeDtypeStruct((B_pad, D_pad), x_pad.dtype),
        )(x_pad, w_cat, b_cat)

    # Large-batch path: tile batch rows; keep weights/bias grid-invariant so
    # they are DMA'd once and stay resident across grid steps.
    # Cap the tile at ~half the batch so the grid has >= 2 steps and both
    # TensorCores get tiles on v7x.
    tb = min(tile_b, _round_up(pl.cdiv(B_pad, 2), SUBLANE))
    grid = (pl.cdiv(B_pad, tb),)   # partial last block is clipped/masked
    return pl.pallas_call(
        _fused_linear_kernel,
        out_shape=jax.ShapeDtypeStruct((B_pad, D_pad), x_pad.dtype),
        grid_spec=pl.GridSpec(
            grid=grid,
            in_specs=[
                pl.BlockSpec((tb, 1), lambda i: (i, 0)),
                pl.BlockSpec((1, D_pad), lambda i: (0, 0)),
                pl.BlockSpec((1, D_pad), lambda i: (0, 0)),
            ],
            out_specs=pl.BlockSpec((tb, D_pad), lambda i: (i, 0)),
        ),
        compiler_params=pltpu.CompilerParams(
            dimension_semantics=("parallel",),  # megacore sharding on v7x
        ),
    )(x_pad, w_cat, b_cat)


class LearnableInputsPallas:
    """JAX/Pallas equivalent of the PyTorch `learnableInputs` module."""

    def __init__(self, num_modes=12, num_slices=10, key=None, dtype=jnp.float32):
        self.num_modes = num_modes
        self.num_slices = num_slices
        if key is None:
            key = jax.random.PRNGKey(42)

        # PyTorch nn.Linear(1, out) init: U(-1, 1) (bound = 1/sqrt(fan_in) = 1).
        def init_linear(k, out_dim):
            kw, kb = jax.random.split(k)
            w = jax.random.uniform(kw, (out_dim, 1), dtype, minval=-1.0, maxval=1.0)
            b = jax.random.uniform(kb, (out_dim,), dtype, minval=-1.0, maxval=1.0)
            return w, b

        keys = jax.random.split(key, 5)
        self.w_modes, self.b_modes = init_linear(keys[0], num_modes)
        self.w_vshift, self.b_vshift = init_linear(keys[1], 3)
        self.w_xshift, self.b_xshift = init_linear(keys[2], num_slices)
        self.w_yshift, self.b_yshift = init_linear(keys[3], num_slices)
        self.w_vrot, self.b_vrot = init_linear(keys[4], 3)

        # Fuse all five layers into one [1, D_pad] weight/bias row.  Segments
        # are packed CONTIGUOUSLY (plain cumulative offsets) and the whole row
        # is padded once to the next multiple of 128 lanes (padding cols = 0),
        # so the fused output stays lane-dense with minimal HBM writeback.
        seg_ws = [self.w_modes, self.w_vshift, self.w_xshift, self.w_yshift, self.w_vrot]
        seg_bs = [self.b_modes, self.b_vshift, self.b_xshift, self.b_yshift, self.b_vrot]
        seg_sizes = [w.shape[0] for w in seg_ws]

        self.seg_offsets = [int(o) for o in np.cumsum([0] + seg_sizes[:-1])]
        self.seg_sizes = seg_sizes
        self.d_total = int(sum(seg_sizes))          # 38 for defaults
        self.d_pad = _round_up(self.d_total, LANE)  # 128 for defaults

        w_row = jnp.concatenate([w.reshape(1, -1) for w in seg_ws], axis=1).astype(dtype)
        b_row = jnp.concatenate([b.reshape(1, -1) for b in seg_bs], axis=1).astype(dtype)
        pad_cols = self.d_pad - self.d_total
        self.w_cat = jnp.pad(w_row, ((0, 0), (0, pad_cols)))
        self.b_cat = jnp.pad(b_row, ((0, 0), (0, pad_cols)))

    def __call__(self, x):
        # x: [B, 1]
        B = x.shape[0]
        nm, ns = self.num_modes, self.num_slices

        # Pad batch only to a full f32 sublane multiple; the grid handles the
        # rest via cdiv + masked partial last block.
        B_pad = _round_up(B, SUBLANE)
        x_pad = jnp.pad(x, ((0, B_pad - B), (0, 0))) if B_pad != B else x

        fused = fused_learnable_inputs(x_pad, self.w_cat, self.b_cat)  # [B_pad, D_pad]

        # Trim once to the 38 useful columns, then carve the five segments
        # from that single contiguous slab.
        useful = fused[:B, :self.d_total]
        o = self.seg_offsets
        modes_output = useful[:, o[0]:o[0] + nm]                        # [B, num_modes]
        volume_shift = useful[:, o[1]:o[1] + 3].reshape(B, 1, 3)        # [B, 1, 3]
        x_shifts = useful[:, o[2]:o[2] + ns].reshape(B, ns, 1)          # [B, num_slices, 1]
        y_shifts = useful[:, o[3]:o[3] + ns].reshape(B, ns, 1)          # [B, num_slices, 1]
        volume_rotations = useful[:, o[4]:o[4] + 3].reshape(B, 1, 3)    # [B, 1, 3]
        return modes_output, volume_shift, x_shifts, y_shifts, volume_rotations


def _reference_forward(model, x):
    """Pure-JAX reference (mirrors the PyTorch forward) for correctness check."""
    B = x.shape[0]
    lin = lambda w, b: x @ w.T + b
    return (
        lin(model.w_modes, model.b_modes),
        lin(model.w_vshift, model.b_vshift).reshape(B, 1, 3),
        lin(model.w_xshift, model.b_xshift).reshape(B, model.num_slices, 1),
        lin(model.w_yshift, model.b_yshift).reshape(B, model.num_slices, 1),
        lin(model.w_vrot, model.b_vrot).reshape(B, 1, 3),
    )


if __name__ == "__main__":
    key = jax.random.PRNGKey(0)
    k_x, k_params = jax.random.split(key)

    batch_size = 2
    num_modes = 12
    num_slices = 10

    # "Dummy" input vector, shape [batch_size, 1] — matches the module contract.
    x = jax.random.normal(k_x, (batch_size, 1), dtype=jnp.float32)

    model = LearnableInputsPallas(num_modes=num_modes, num_slices=num_slices, key=k_params)

    outs = model(x)
    outs = jax.block_until_ready(outs)

    # Verify shapes and values against the pure-JAX reference.
    refs = _reference_forward(model, x)
    expected_shapes = [
        (batch_size, num_modes),
        (batch_size, 1, 3),
        (batch_size, num_slices, 1),
        (batch_size, num_slices, 1),
        (batch_size, 1, 3),
    ]
    for out_arr, ref_arr, shp in zip(outs, refs, expected_shapes):
        assert out_arr.shape == shp, (out_arr.shape, shp)
        assert jnp.allclose(out_arr, ref_arr, atol=1e-6), "mismatch vs reference"

    # Also exercise the tiled large-batch path (cdiv grid, partial last block,
    # >= 2 grid steps for the parallel axis).
    big_B = TILE_B * 2 + 13
    x_big = jax.random.normal(k_x, (big_B, 1), dtype=jnp.float32)
    outs_big = jax.block_until_ready(model(x_big))
    refs_big = _reference_forward(model, x_big)
    for out_arr, ref_arr in zip(outs_big, refs_big):
        assert out_arr.shape == ref_arr.shape
        assert jnp.allclose(out_arr, ref_arr, atol=1e-6), "mismatch vs reference (big B)"

    print("KERNEL_OK")
</pallas_src>

<mosaic_0001>
module attributes {stable_mosaic.version = 11 : i64} {
  func.func @_fused_linear_kernel(%arg0: memref<8x1xf32, #tpu.memory_space<vmem>>, %arg1: memref<1x128xf32, #tpu.memory_space<vmem>>, %arg2: memref<1x128xf32, #tpu.memory_space<vmem>>, %arg3: memref<8x128xf32, #tpu.memory_space<vmem>>) attributes {dimension_semantics = [], scalar_prefetch = 0 : i64, scratch_operands = 0 : i64, tpu.core_type = #tpu.core_type<tc>} {
    %c0 = arith.constant 0 : index
    %c0_0 = arith.constant 0 : index
    %0 = vector.load %arg0[%c0, %c0_0] : memref<8x1xf32, #tpu.memory_space<vmem>>, vector<8x1xf32>
    %c0_1 = arith.constant 0 : index
    %c0_2 = arith.constant 0 : index
    %1 = vector.load %arg1[%c0_1, %c0_2] : memref<1x128xf32, #tpu.memory_space<vmem>>, vector<1x128xf32>
    %2 = vector.broadcast %0 : vector<8x1xf32> to vector<8x128xf32>
    %3 = vector.broadcast %1 : vector<1x128xf32> to vector<8x128xf32>
    %4 = arith.mulf %2, %3 : vector<8x128xf32>
    %c0_3 = arith.constant 0 : index
    %c0_4 = arith.constant 0 : index
    %5 = vector.load %arg2[%c0_3, %c0_4] : memref<1x128xf32, #tpu.memory_space<vmem>>, vector<1x128xf32>
    %6 = vector.broadcast %5 : vector<1x128xf32> to vector<8x128xf32>
    %7 = arith.addf %4, %6 : vector<8x128xf32>
    %c0_5 = arith.constant 0 : index
    %c0_6 = arith.constant 0 : index
    %8 = vector.load %arg3[%c0_5, %c0_6] : memref<8x128xf32, #tpu.memory_space<vmem>>, vector<8x128xf32>
    tpu.vector_store %arg3[%c0_5, %c0_6], %7 {strides = array<i32>} : memref<8x128xf32, #tpu.memory_space<vmem>>, vector<8x128xf32>,
    return
  }
}

</mosaic_0001>

<bundles_post_ra>
// kernel: tpu_custom_call.1
= control target key start
LH: loop header
LB: loop body
LE: loop exit
PB: predicated region body
PF: predicated region fallthrough
CT: control target
= control target key end

     0   :  { %s113_s0 = inlined_call_operand.vmem [shape: f32[8,1], index: 0, kind: input, shape index: {}]   ;;  %s114_s1 = inlined_call_operand.vmem [shape: f32[1,128], index: 1, kind: input, shape index: {}]   ;;  %s115_s2 = inlined_call_operand.vmem [shape: f32[1,128], index: 2, kind: input, shape index: {}]   ;;  %s116_s3 = inlined_call_operand.hbm [shape: f32[8,128], index: 3, kind: output, shape index: {}]  }
   0x1   :  { %v15_v0 = vld [vmem:[%s113_s0] sm:$0xff] }
   0x2   :  { %8 = vsyncpa [#allocation3], 0  ;;  %v79_v1 = vmov 0   ;;  %v52_v2 = vld [vmem:[%s114_s1] ss:$0 sm:$0xff]  ;;  %s80_s18 = smov [#allocation2]  }
   0x3   :  { %56 = vset.pattern.permute.xlu0 %v79_v1  ;;  %v53_v4 = vld [vmem:[%s115_s2] ss:$0 sm:$0xff]  ;;  %s44_s19 = sshll.u32 %s80_s18, 4  ;;  %s45_s19 = int_to_ptr.vmem [resolvable:$true] %s44_s19 }
   0x4   :  { %19 = vperm.xlu0 %56, %v15_v0   ;;  %s57_s0 = scalar_lea.vmem %s45_s19, 128  ;;  %p62_p1 = scmp.lt.s32.totalorder %s45_s19, %s45_s19 }
   0x5   :  { %p58_p0 = scmp.ne.s32.totalorder %s45_s19, %s57_s0  ;;  %p63_p2 = scmp.lt.s32.totalorder %s57_s0, %s57_s0 }
   0x7   :  { %p64_p3 = por %p63_p2, %p62_p1 }
   0x9   :  { %p65_p4 = pnand %p64_p3, %p58_p0 }
  0x7f   :  { %v20_v3 = vpop.permute.xlu0 %19 }
  0x80   :  { %v28_v5 = vmul.f32 %v52_v2, %v20_v3 }
  0x82   :  { %v36_v6 = vadd.f32 %v53_v4, %v28_v5 }
  0x84   :  { %37 = vst [vmem:[#allocation2] sm:$0xff] %v36_v6 }
  0x85   :  { %68 = shalt.err (!%p65_p4)
}
  0x86   :  { %47 = dma.vmem_to_hbm [thread:$0]  %s45_s19, 128, %s116_s3, [#allocation3]  }
  0x87   :  { %77 = dma.done.wait [#allocation3], 128  }
  0x88   :  { %78 = vsyncadd [#allocation3], 4294967168 }
  0x89   :  { %51 = vsyncpa [#allocation3], 1 }

</bundles_post_ra>
